<compile_context>
chip_gen: v6e
topology: v6e:2x2x1
jax: 0.10.0
libtpu: 0.0.40
codegen_flags: <defaults>
</compile_context>

<pallas_src>
import jax
import jax.numpy as jnp
from jax.experimental import pallas as pl
from jax.experimental.pallas import tpu as pltpu

# Hyper-parameters from the PyTorch module __init__
GAMMA = 2.0            # focal exponent (== 2 -> explicit square in-kernel)
BALANCE_PARAM = 2.0
MAP_ALPHA = 0.1
MAP_BETA = 10.0
MAP_GAMMA = 0.2
NEG_SCALE = 2.0
INIT_BIAS_SCALE = 0.05

# Padding logit: drives bce, (1-pt)^2 and therefore every padded element's
# loss contribution to exactly 0 in f32.
_PAD_LOGIT = -1e4
_EPS_REPEAT = 1e-12


def _round_up(x, m):
    return (x + m - 1) // m * m


def _db_loss_kernel(score_ref, label_ref, freq_inv_ref, init_bias_ref,
                    out_ref, acc_ref):
    i = pl.program_id(1)                       # inner (reduction) grid axis

    @pl.when(i == 0)
    def _():
        acc_ref[...] = jnp.zeros_like(acc_ref)

    # Inputs arrive in their native (possibly bf16 / int) dtype; cast on-chip.
    x = score_ref[...].astype(jnp.float32)     # (TN, Cp) logits
    y = label_ref[...].astype(jnp.float32)     # (TN, Cp) binary labels
    freq_inv = freq_inv_ref[...]               # (1, Cp)
    init_bias = init_bias_ref[...]             # (1, Cp)

    # ---- rebalance_weight --------------------------------------------------
    repeat_rate = jnp.sum(y * freq_inv, axis=1, keepdims=True)      # (TN, 1)
    # Guard rows with no positive label (PyTorch would produce inf/NaN here;
    # only padded rows hit this path in practice, and they contribute 0 loss).
    repeat_rate = jnp.maximum(repeat_rate, _EPS_REPEAT)
    inv_rr = 1.0 / repeat_rate                 # exact; only TN divides / tile
    pos_weight = freq_inv * inv_rr                                  # (TN, Cp)
    weight = jax.nn.sigmoid(MAP_BETA * (pos_weight - MAP_GAMMA)) + MAP_ALPHA

    # ---- logit_reg_functions (algebraically folded; exact for y in {0,1}) --
    #   logits*(1-y)*s + logits*y  == logits * (s - (s-1)*y)
    #   weight/s*(1-y) + weight*y  == weight * (1/s + (1-1/s)*y)
    logits = (x + init_bias) * (NEG_SCALE - (NEG_SCALE - 1.0) * y)
    weight = weight * ((1.0 / NEG_SCALE) + (1.0 - 1.0 / NEG_SCALE) * y)

    # ---- BCE-with-logits (reduction='none') --------------------------------
    # bce(z, y) = max(z, 0) - z*y + log1p(exp(-|z|))
    bce = (jnp.maximum(logits, 0.0) - logits * y
           + jnp.log1p(jnp.exp(-jnp.abs(logits))))

    # focal modulation: logpt = -bce, pt = exp(logpt); gamma == 2 -> square
    pt = jnp.exp(-bce)
    omp = 1.0 - pt
    loss = (BALANCE_PARAM * omp * omp) * weight * bce

    # Deferred reduction: per-step work stays on the VPU; the cross-sublane /
    # cross-lane XLU reduce happens only once, below.
    acc_ref[...] += loss

    @pl.when(i == pl.num_programs(1) - 1)
    def _():
        partial = jnp.sum(acc_ref[...], dtype=jnp.float32)
        # Lane-dense (1, 8, 128) output slab -> unmasked vector store.
        out_ref[...] = jnp.broadcast_to(partial, out_ref.shape)


def db_loss_mean(cls_score, label, freq_inv, init_bias, *,
                 row_tile=None, num_core_slices=2,
                 vmem_limit_bytes=32 * 1024 * 1024):
    """DistributionBalancedLoss forward with reduction='mean'.

    Precondition (as in the PyTorch module): every real row should contain at
    least one positive label; rows without positives have their repeat_rate
    clamped to eps instead of producing inf/NaN.
    """
    n, c = cls_score.shape
    assert label.shape == (n, c)

    # ---- class (lane) padding to a multiple of 128 --------------------------
    c_pad = max(128, _round_up(c, 128))

    # ---- row tiling / two-core split ----------------------------------------
    n_par = max(1, int(num_core_slices))
    tn = 512 if row_tile is None else int(row_tile)
    # VMEM budget per tile row: 2 inputs x 2 pipeline buffers + f32 accumulator
    # (keeps us comfortably inside v7x's 64 MiB physical / 32 MiB scoped VMEM).
    per_row = (c_pad * 2 * (cls_score.dtype.itemsize + label.dtype.itemsize)
               + c_pad * 4)
    max_tn = max(8, int(0.6 * vmem_limit_bytes) // per_row // 8 * 8)
    tn = min(tn, max_tn, _round_up(pl.cdiv(n, n_par), 8))
    tn = max(8, _round_up(tn, 8))

    rows_per_slice = _round_up(pl.cdiv(n, n_par), tn)
    steps = rows_per_slice // tn
    n_pad = n_par * rows_per_slice

    pad_r, pad_c = n_pad - n, c_pad - c
    if pad_r or pad_c:
        # Padded logits at a large negative value with zero labels give exactly
        # zero loss; zero freq_inv padding leaves repeat_rate unchanged.
        cls_score = jnp.pad(cls_score, ((0, pad_r), (0, pad_c)),
                            constant_values=_PAD_LOGIT)
        label = jnp.pad(label, ((0, pad_r), (0, pad_c)))
    freq_inv_2d = jnp.pad(freq_inv.reshape(1, c).astype(jnp.float32),
                          ((0, 0), (0, pad_c)))
    init_bias_2d = jnp.pad(init_bias.reshape(1, c).astype(jnp.float32),
                           ((0, 0), (0, pad_c)))

    row_map = lambda p, i: (p * steps + i, 0)

    partials = pl.pallas_call(
        _db_loss_kernel,
        out_shape=jax.ShapeDtypeStruct((n_par, 8, 128), jnp.float32),
        grid_spec=pltpu.PrefetchScalarGridSpec(
            num_scalar_prefetch=0,
            grid=(n_par, steps),
            in_specs=[
                pl.BlockSpec((tn, c_pad), row_map),              # cls_score (native dtype)
                pl.BlockSpec((tn, c_pad), row_map),              # label (native dtype)
                pl.BlockSpec((1, c_pad), lambda p, i: (0, 0)),   # freq_inv (resident)
                pl.BlockSpec((1, c_pad), lambda p, i: (0, 0)),   # init_bias (resident)
            ],
            out_specs=pl.BlockSpec((1, 8, 128), lambda p, i: (p, 0, 0)),
            scratch_shapes=[pltpu.VMEM((tn, c_pad), jnp.float32)],
        ),
        compiler_params=pltpu.CompilerParams(
            dimension_semantics=("parallel", "arbitrary"),
            vmem_limit_bytes=vmem_limit_bytes),
    )(cls_score, label, freq_inv_2d, init_bias_2d)

    # Final tiny cross-slice sum + 'mean' normalisation outside the kernel
    # (divisor uses the ORIGINAL n*c, so padding never changes the mean).
    return jnp.sum(partials[:, 0, 0]) / jnp.float32(n * c)


# ------------------------- pure-JAX reference -------------------------------
def db_loss_ref(cls_score, label, freq_inv, init_bias):
    x = cls_score.astype(jnp.float32)
    y = label.astype(jnp.float32)
    fi = freq_inv.reshape(1, -1).astype(jnp.float32)
    ib = init_bias.reshape(1, -1).astype(jnp.float32)

    repeat_rate = jnp.sum(y * fi, axis=1, keepdims=True)
    pos_weight = fi / repeat_rate
    weight = jax.nn.sigmoid(MAP_BETA * (pos_weight - MAP_GAMMA)) + MAP_ALPHA

    logits = x + ib
    logits = logits * (1.0 - y) * NEG_SCALE + logits * y
    weight = weight / NEG_SCALE * (1.0 - y) + weight * y

    bce = (jnp.maximum(logits, 0.0) - logits * y
           + jnp.log1p(jnp.exp(-jnp.abs(logits))))
    pt = jnp.exp(-bce)
    loss = weight * bce
    loss = (1.0 - pt) ** GAMMA * loss
    loss = BALANCE_PARAM * loss
    return jnp.mean(loss)


if __name__ == "__main__":
    N, C = 8, 128  # batch, num_classes (small demo shapes)

    key = jax.random.PRNGKey(0)
    k_score, k_label, k_pos, k_neg = jax.random.split(key, 4)

    # Deterministic synthetic class-frequency statistics (module __init__ args).
    pos_counts = 10.0 + jax.random.uniform(k_pos, (C,)) * 90.0          # (C,)
    neg_counts = 200.0 + jax.random.uniform(k_neg, (C,)) * 800.0        # (C,)
    train_num = pos_counts[0] + neg_counts[0]
    init_bias = (-jnp.log(train_num / pos_counts - 1.0)
                 * INIT_BIAS_SCALE / NEG_SCALE)                         # (C,)
    freq_inv = jnp.ones_like(pos_counts) / pos_counts                   # (C,)

    # Stream inputs in a narrow dtype (bf16); the kernel casts to f32 on-chip.
    cls_score = jax.random.normal(k_score, (N, C),
                                  dtype=jnp.float32).astype(jnp.bfloat16)
    label = (jax.random.uniform(k_label, (N, C)) < 0.3).astype(jnp.bfloat16)
    # precondition: every row has at least one positive label
    label = label.at[:, 0].set(1.0)

    loss = db_loss_mean(cls_score, label, freq_inv, init_bias)
    loss = jax.block_until_ready(loss)

    ref = db_loss_ref(cls_score, label, freq_inv, init_bias)
    assert jnp.allclose(loss, ref, rtol=1e-4, atol=1e-5), (loss, ref)

    # TODO(synk): only reduction='mean' is fused in-kernel; 'none'/'sum' would
    # skip or change the final reduction step.
    print("KERNEL_OK")
</pallas_src>

<mosaic_0001>
module attributes {stable_mosaic.version = 11 : i64} {
  func.func @_db_loss_kernel(%arg0: i32, %arg1: i32, %arg2: memref<8x128xbf16, #tpu.memory_space<vmem>>, %arg3: memref<8x128xbf16, #tpu.memory_space<vmem>>, %arg4: memref<1x128xf32, #tpu.memory_space<vmem>>, %arg5: memref<1x128xf32, #tpu.memory_space<vmem>>, %arg6: memref<1x8x128xf32, #tpu.memory_space<vmem>>, %arg7: memref<8x128xf32, #tpu.memory_space<vmem>>) attributes {dimension_semantics = [#tpu.dimension_semantics<parallel>, #tpu.dimension_semantics<arbitrary>], iteration_bounds = array<i64: 2, 1>, scalar_prefetch = 0 : i64, scratch_operands = 1 : i64, tpu.core_type = #tpu.core_type<tc>, window_params = [{transform_indices = @transform_0, window_bounds = array<i64: 8, 128>}, {transform_indices = @transform_1, window_bounds = array<i64: 8, 128>}, {pipeline_mode = #tpu.pipeline_mode<synchronous>, transform_indices = @transform_2, window_bounds = array<i64: 1, 128>}, {pipeline_mode = #tpu.pipeline_mode<synchronous>, transform_indices = @transform_3, window_bounds = array<i64: 1, 128>}, {transform_indices = @transform_4, window_bounds = array<i64: 1, 8, 128>}]} {
    %c0_i32 = arith.constant 0 : i32
    %0 = arith.cmpi eq, %arg1, %c0_i32 : i32
    %1 = arith.extui %0 : i1 to i32
    %c0_i32_0 = arith.constant 0 : i32
    %2 = arith.cmpi ne, %1, %c0_i32_0 : i32
    scf.if %2 {
      %cst_29 = arith.constant 0.000000e+00 : f32
      %69 = vector.broadcast %cst_29 : f32 to vector<8x128xf32>
      %c0_30 = arith.constant 0 : index
      %c0_31 = arith.constant 0 : index
      %70 = vector.load %arg7[%c0_30, %c0_31] : memref<8x128xf32, #tpu.memory_space<vmem>>, vector<8x128xf32>
      tpu.vector_store %arg7[%c0_30, %c0_31], %69 {strides = array<i32>} : memref<8x128xf32, #tpu.memory_space<vmem>>, vector<8x128xf32>,
    } else {
    }
    %c0 = arith.constant 0 : index
    %c0_1 = arith.constant 0 : index
    %3 = vector.load %arg2[%c0, %c0_1] : memref<8x128xbf16, #tpu.memory_space<vmem>>, vector<8x128xbf16>
    %4 = arith.extf %3 : vector<8x128xbf16> to vector<8x128xf32>
    %c0_2 = arith.constant 0 : index
    %c0_3 = arith.constant 0 : index
    %5 = vector.load %arg3[%c0_2, %c0_3] : memref<8x128xbf16, #tpu.memory_space<vmem>>, vector<8x128xbf16>
    %6 = arith.extf %5 : vector<8x128xbf16> to vector<8x128xf32>
    %c0_4 = arith.constant 0 : index
    %c0_5 = arith.constant 0 : index
    %7 = vector.load %arg4[%c0_4, %c0_5] : memref<1x128xf32, #tpu.memory_space<vmem>>, vector<1x128xf32>
    %c0_6 = arith.constant 0 : index
    %c0_7 = arith.constant 0 : index
    %8 = vector.load %arg5[%c0_6, %c0_7] : memref<1x128xf32, #tpu.memory_space<vmem>>, vector<1x128xf32>
    %9 = vector.broadcast %7 : vector<1x128xf32> to vector<8x128xf32>
    %10 = arith.mulf %6, %9 : vector<8x128xf32>
    %cst = arith.constant dense<0.000000e+00> : vector<8xf32>
    %11 = vector.multi_reduction <add>, %10, %cst [1] : vector<8x128xf32> to vector<8xf32>
    %12 = vector.shape_cast %11 : vector<8xf32> to vector<8x1xf32>
    %cst_8 = arith.constant 9.99999996E-13 : f32
    %13 = vector.broadcast %cst_8 : f32 to vector<8x1xf32>
    %14 = arith.maximumf %12, %13 : vector<8x1xf32>
    %cst_9 = arith.constant 1.000000e+00 : f32
    %15 = vector.broadcast %cst_9 : f32 to vector<8x1xf32>
    %16 = arith.divf %15, %14 : vector<8x1xf32>
    %17 = vector.broadcast %7 : vector<1x128xf32> to vector<8x128xf32>
    %18 = vector.broadcast %16 : vector<8x1xf32> to vector<8x128xf32>
    %19 = arith.mulf %17, %18 : vector<8x128xf32>
    %cst_10 = arith.constant 2.000000e-01 : f32
    %20 = vector.broadcast %cst_10 : f32 to vector<8x128xf32>
    %21 = arith.subf %19, %20 : vector<8x128xf32>
    %cst_11 = arith.constant 1.000000e+01 : f32
    %22 = vector.broadcast %cst_11 : f32 to vector<8x128xf32>
    %23 = arith.mulf %22, %21 : vector<8x128xf32>
    %24 = arith.negf %23 : vector<8x128xf32>
    %25 = math.exp %24 : vector<8x128xf32>
    %cst_12 = arith.constant 1.000000e+00 : f32
    %26 = vector.broadcast %cst_12 : f32 to vector<8x128xf32>
    %27 = arith.addf %26, %25 : vector<8x128xf32>
    %28 = arith.divf %26, %27 : vector<8x128xf32>
    %cst_13 = arith.constant 1.000000e-01 : f32
    %29 = vector.broadcast %cst_13 : f32 to vector<8x128xf32>
    %30 = arith.addf %28, %29 : vector<8x128xf32>
    %31 = vector.broadcast %8 : vector<1x128xf32> to vector<8x128xf32>
    %32 = arith.addf %4, %31 : vector<8x128xf32>
    %cst_14 = arith.constant 1.000000e+00 : f32
    %33 = vector.broadcast %cst_14 : f32 to vector<8x128xf32>
    %34 = arith.mulf %33, %6 : vector<8x128xf32>
    %cst_15 = arith.constant 2.000000e+00 : f32
    %35 = vector.broadcast %cst_15 : f32 to vector<8x128xf32>
    %36 = arith.subf %35, %34 : vector<8x128xf32>
    %37 = arith.mulf %32, %36 : vector<8x128xf32>
    %cst_16 = arith.constant 5.000000e-01 : f32
    %38 = vector.broadcast %cst_16 : f32 to vector<8x128xf32>
    %39 = arith.mulf %38, %6 : vector<8x128xf32>
    %cst_17 = arith.constant 5.000000e-01 : f32
    %40 = vector.broadcast %cst_17 : f32 to vector<8x128xf32>
    %41 = arith.addf %40, %39 : vector<8x128xf32>
    %42 = arith.mulf %30, %41 : vector<8x128xf32>
    %cst_18 = arith.constant 0.000000e+00 : f32
    %43 = vector.broadcast %cst_18 : f32 to vector<8x128xf32>
    %44 = arith.maximumf %37, %43 : vector<8x128xf32>
    %45 = arith.mulf %37, %6 : vector<8x128xf32>
    %46 = arith.subf %44, %45 : vector<8x128xf32>
    %47 = math.absf %37 : vector<8x128xf32>
    %cst_19 = arith.constant 0.000000e+00 : f32
    %48 = vector.broadcast %cst_19 : f32 to vector<8x128xf32>
    %49 = arith.subf %48, %47 : vector<8x128xf32>
    %50 = math.exp %49 : vector<8x128xf32>
    %51 = math.log1p %50 : vector<8x128xf32>
    %52 = arith.addf %46, %51 : vector<8x128xf32>
    %cst_20 = arith.constant 0.000000e+00 : f32
    %53 = vector.broadcast %cst_20 : f32 to vector<8x128xf32>
    %54 = arith.subf %53, %52 : vector<8x128xf32>
    %55 = math.exp %54 : vector<8x128xf32>
    %cst_21 = arith.constant 1.000000e+00 : f32
    %56 = vector.broadcast %cst_21 : f32 to vector<8x128xf32>
    %57 = arith.subf %56, %55 : vector<8x128xf32>
    %cst_22 = arith.constant 2.000000e+00 : f32
    %58 = vector.broadcast %cst_22 : f32 to vector<8x128xf32>
    %59 = arith.mulf %58, %57 : vector<8x128xf32>
    %60 = arith.mulf %59, %57 : vector<8x128xf32>
    %61 = arith.mulf %60, %42 : vector<8x128xf32>
    %62 = arith.mulf %61, %52 : vector<8x128xf32>
    %c0_23 = arith.constant 0 : index
    %c0_24 = arith.constant 0 : index
    %63 = vector.load %arg7[%c0_23, %c0_24] : memref<8x128xf32, #tpu.memory_space<vmem>>, vector<8x128xf32>
    %64 = arith.addf %63, %62 : vector<8x128xf32>
    %c0_25 = arith.constant 0 : index
    %c0_26 = arith.constant 0 : index
    %65 = vector.load %arg7[%c0_25, %c0_26] : memref<8x128xf32, #tpu.memory_space<vmem>>, vector<8x128xf32>
    tpu.vector_store %arg7[%c0_25, %c0_26], %64 {strides = array<i32>} : memref<8x128xf32, #tpu.memory_space<vmem>>, vector<8x128xf32>,
    %c0_i32_27 = arith.constant 0 : i32
    %66 = arith.cmpi eq, %arg1, %c0_i32_27 : i32
    %67 = arith.extui %66 : i1 to i32
    %c0_i32_28 = arith.constant 0 : i32
    %68 = arith.cmpi ne, %67, %c0_i32_28 : i32
    scf.if %68 {
      %c0_29 = arith.constant 0 : index
      %c0_30 = arith.constant 0 : index
      %69 = vector.load %arg7[%c0_29, %c0_30] : memref<8x128xf32, #tpu.memory_space<vmem>>, vector<8x128xf32>
      %70 = vector.shape_cast %69 : vector<8x128xf32> to vector<1x8x128xf32>
      %cst_31 = arith.constant dense<0.000000e+00> : vector<1xf32>
      %71 = vector.multi_reduction <add>, %70, %cst_31 [1, 2] : vector<1x8x128xf32> to vector<1xf32>
      %72 = vector.shape_cast %71 : vector<1xf32> to vector<1x1x1xf32>
      %73 = vector.extract %72[0, 0, 0] : f32 from vector<1x1x1xf32>
      %74 = vector.broadcast %73 : f32 to vector<1x8x128xf32>
      %c0_32 = arith.constant 0 : index
      %c0_33 = arith.constant 0 : index
      %c0_34 = arith.constant 0 : index
      %75 = vector.load %arg6[%c0_32, %c0_33, %c0_34] : memref<1x8x128xf32, #tpu.memory_space<vmem>>, vector<1x8x128xf32>
      tpu.vector_store %arg6[%c0_32, %c0_33, %c0_34], %74 {strides = array<i32>} : memref<1x8x128xf32, #tpu.memory_space<vmem>>, vector<1x8x128xf32>,
    } else {
    }
    return
  }
  func.func @transform_0(%arg0: i32, %arg1: i32) -> (i32, i32) {
    %c1_i32 = arith.constant 1 : i32
    %0 = arith.muli %arg0, %c1_i32 : i32
    %1 = arith.addi %0, %arg1 : i32
    %c0_i32 = arith.constant 0 : i32
    %c0_i32_0 = arith.constant 0 : i32
    return %1, %c0_i32 : i32, i32
  }
  func.func @transform_1(%arg0: i32, %arg1: i32) -> (i32, i32) {
    %c1_i32 = arith.constant 1 : i32
    %0 = arith.muli %arg0, %c1_i32 : i32
    %1 = arith.addi %0, %arg1 : i32
    %c0_i32 = arith.constant 0 : i32
    %c0_i32_0 = arith.constant 0 : i32
    return %1, %c0_i32 : i32, i32
  }
  func.func @transform_2(%arg0: i32, %arg1: i32) -> (i32, i32) {
    %c0_i32 = arith.constant 0 : i32
    %c0_i32_0 = arith.constant 0 : i32
    %c0_i32_1 = arith.constant 0 : i32
    return %c0_i32, %c0_i32_0 : i32, i32
  }
  func.func @transform_3(%arg0: i32, %arg1: i32) -> (i32, i32) {
    %c0_i32 = arith.constant 0 : i32
    %c0_i32_0 = arith.constant 0 : i32
    %c0_i32_1 = arith.constant 0 : i32
    return %c0_i32, %c0_i32_0 : i32, i32
  }
  func.func @transform_4(%arg0: i32, %arg1: i32) -> (i32, i32, i32) {
    %c0_i32 = arith.constant 0 : i32
    %c0_i32_0 = arith.constant 0 : i32
    %c0_i32_1 = arith.constant 0 : i32
    return %arg0, %c0_i32, %c0_i32_0 : i32, i32, i32
  }
}

</mosaic_0001>

<bundles_post_ra>
// kernel: tpu_custom_call.1
= control target key start
LH: loop header
LB: loop body
LE: loop exit
PB: predicated region body
PF: predicated region fallthrough
CT: control target
= control target key end

     0   :  { %9 = vsyncpa [#allocation4], 0  ;;  %s920_s0 = inlined_call_operand.hbm [shape: bf16[16,128], index: 0, kind: input, shape index: {}]   ;;  %s921_s1 = inlined_call_operand.hbm [shape: bf16[16,128], index: 1, kind: input, shape index: {}]   ;;  %s922_s2 = inlined_call_operand.vmem [shape: f32[1,128], index: 2, kind: input, shape index: {}]   ;;  %s923_s3 = inlined_call_operand.vmem [shape: f32[1,128], index: 3, kind: input, shape index: {}]   ;;  %s924_s4 = inlined_call_operand.hbm [shape: f32[2,8,128], index: 4, kind: output, shape index: {}]  }
   0x1   :  { %11 = vsyncpa [#allocation4 + $0x1], 0 }
   0x2   :  { %12 = vsyncpa [#allocation7], 0 }
   0x3   :  { %14 = vsyncpa [#allocation7 + $0x1], 0 }
   0x4   :  { %15 = vsyncpa [#allocation5], 0 }
   0x5   :  { %17 = vsyncpa [#allocation5 + $0x1], 0  ;;  %s746_s15 = smov 0   ;;  %s748_s16 = smov 0  }
   0x6   :  { %s750_s17 = smov 0   ;;  %s752_s18 = smov 0  }
   0x7   :  { %s754_s19 = smov 0   ;;  %s756_s20 = smov 0  }
   0x8 LB: > { %s475_s21 = sadd.s32 4294967295, %s716_s20   ;;  %s476_s22 = sadd.s32 4294967294, %s716_s20   ;;  %s716_s20 = sphi %s756_s20, %s23_s20   ;;  %s712_s19 = sphi %s754_s19, %s936_s19   ;;  %s708_s18 = sphi %s752_s18, %s935_s18   ;;  %s704_s17 = sphi %s750_s17, %s934_s17   ;;  %s700_s16 = sphi %s748_s16, %s933_s16   ;;  %s696_s15 = sphi %s746_s15, %s932_s15  }
   0x9   : > { %s35_s23 = sadd.s32 1, %s712_s19  ;;  %s44_s24 = sadd.s32 1, %s704_s17 }
   0xa   : > { %p37_p0 = scmp.ge.s32.totalorder %s35_s23, 2  ;;  %p51_p1 = scmp.ne.s32.totalorder %s704_s17, %s700_s16 }
   0xb   : > { %p52_p2 = scmp.eq.s32.totalorder %s716_s20, 0  ;;  %p57_p3 = scmp.ne.s32.totalorder %s700_s16, %s696_s15 }
   0xc   : > { %s938_s23 = smov (%p37_p0, %s35_s23), 0  ;;  %p58_p5 = scmp.eq.s32.totalorder %s475_s21, 0 }
   0xd   : > { %p787_p4 = por %p52_p2, %p51_p1  ;;  %s41_s26 = ssub.s32 %s712_s19, %s938_s23 }
   0xe   : > { %p151_p6 = scmp.eq.s32.totalorder %s475_s21, 1  ;;  %p42_p7 = scmp.eq.s32.totalorder %s41_s26, 0 }
   0xf   : > { %p793_p8 = por %p58_p5, %p57_p3  ;;  %p157_p10 = scmp.eq.s32.totalorder %s476_s22, 1 }
  0x10   : > { %p797_p9 = por %p151_p6, %p51_p1  ;;  %p514_p13 = scmp.lt.s32.totalorder %s716_s20, 2 }
  0x11   : > { %s802_s29 = scalar_select %p42_p7, %s704_s17, %s44_s24  }
  0x12   : > { %p804_p11 = por %p157_p10, %p57_p3  ;;  %s811_s5 = sand.u32 1, %s704_s17  }
  0x13   : > { %s479_s6 = sshll.u32 %s811_s5, 2  ;;  %s480_s7 = sshll.u32 %s712_s19, 6 }
  0x14   : > { %s193_s10 = scalar_lea.hbm %s920_s0, %s480_s7  ;;  %s187_s11 = scalar_lea.vmem [#allocation3], %s479_s6 }
  0x15   : > { %s195_s12 = sshll.u32 %s187_s11, 4  ;;  %p820_p0 = pnand %p514_p13, %p787_p4  ;;  %s196_s12 = int_to_ptr.vmem [resolvable:$true] %s195_s12 }
  0x16   : > { %p483_p1 = scmp.ge.s32.totalorder %s716_s20, 1  ;;  %p219_p2 = scmp.lt.s32.totalorder %s716_s20, 3 }
  0x17   : > { %s184_s14 = scalar_lea.sflag [#allocation4], %s811_s5  ;;  %p578_p3 = pneg %p820_p0 }
  0x18   : > { %s589_s21 = scalar_lea.vmem %s196_s12, 64  ;;  %s718_s22 = smov [#allocation3]  }
  0x19   : > { %p590_p5 = scmp.ne.s32.totalorder %s196_s12, %s589_s21  ;;  %s594_s24 = sshll.u32 %s718_s22, 4  ;;  %s595_s24 = int_to_ptr.vmem [resolvable:$false] %s594_s24 }
  0x1a   : > { %s596_s25 = scalar_lea.vmem %s595_s24, 128  ;;  %p597_p4 = scmp.lt.s32.totalorder %s196_s12, %s595_s24 }
  0x1b   : > { %p592_p6 = pnand %p590_p5, %p578_p3  ;;  %p598_p10 = scmp.lt.s32.totalorder %s596_s25, %s589_s21 }
  0x1d   : > { %p593_p7 = pneg %p592_p6  ;;  %p599_p13 = por %p598_p10, %p597_p4 }
  0x1f   : > { %p600_p12 = pnand %p599_p13, %p593_p7 }
  0x21   : > { %603 = shalt.err (!%p600_p12)
}
  0x22   : > { %506 = dma.hbm_to_vmem [thread:$0]  (!%p820_p0), %s193_s10, 64, %s196_s12, %s184_s14  }
  0x23   : > { %p838_p5 = pnand %p483_p1, %p219_p2  ;;  %s212_s11 = scalar_lea.hbm %s921_s1, %s480_s7 }
  0x24   : > { %s206_s21 = scalar_lea.vmem [#allocation6], %s479_s6  ;;  %s203_s24 = scalar_lea.sflag [#allocation7], %s811_s5 }
  0x25   : > { %s214_s22 = sshll.u32 %s206_s21, 4  ;;  %s719_s10 = smov [#allocation6]   ;;  %s215_s22 = int_to_ptr.vmem [resolvable:$true] %s214_s22 }
  0x26   : > { %s617_s25 = scalar_lea.vmem %s215_s22, 64  ;;  %s622_s12 = sshll.u32 %s719_s10, 4  ;;  %s623_s12 = int_to_ptr.vmem [resolvable:$false] %s622_s12 }
  0x27   : > { %p618_p12 = scmp.ne.s32.totalorder %s215_s22, %s617_s25  ;;  %s624_s14 = scalar_lea.vmem %s623_s12, 128 }
  0x28   : > { %p625_p1 = scmp.lt.s32.totalorder %s215_s22, %s623_s12  ;;  %p626_p2 = scmp.lt.s32.totalorder %s624_s14, %s617_s25 }
  0x29   : > { %p620_p6 = pnand %p618_p12, %p578_p3 }
  0x2a   : > { %p627_p4 = por %p626_p2, %p625_p1 }
  0x2b   : > { %p621_p7 = pneg %p620_p6 }
  0x2d   : > { %p628_p10 = pnand %p627_p4, %p621_p7 }
  0x2f   : > { %631 = shalt.err (!%p628_p10)
}
  0x30   : > { %509 = dma.hbm_to_vmem [thread:$0]  (!%p820_p0), %s212_s11, 64, %s215_s22, %s203_s24  }
  0x31   : > { %223 = sbr.rel (%p838_p5) target bundleno = 476 (0x1dc), region = 36  ;;  %s854_s5 = sand.u32 (!%p838_p5), 1, %s700_s16  }
  0x32   : > { %s484_s6 = sshll.u32 (!%p838_p5), %s854_s5, 2  ;;  %s226_s7 = scalar_lea.sflag (!%p838_p5), [#allocation4], %s854_s5 }
  0x33   : > { %s229_s8 = scalar_lea.vmem (!%p838_p5), [#allocation3], %s484_s6 }
  0x36   : > { %683 = dma.done.wait (%p793_p8), %s226_s7, 64  }
  0x37   : > { %685 = vsyncadd (%p793_p8), %s226_s7, 4294967232  ;;  %s235_s13 = scalar_lea.sflag [#allocation7], %s854_s5  ;;  %s238_s9 = scalar_lea.vmem [#allocation6], %s484_s6 }
  0x38   : > { %687 = dma.done.wait (%p793_p8), %s235_s13, 64  }
  0x39   : > { %689 = vsyncadd (%p793_p8), %s235_s13, 4294967232  ;;  %v277_v0 = vld [vmem:[%s238_s9] sm:$0xf]  ;;  %v487_v1 = vld [vmem:[%s922_s2] ss:$0 sm:$0xff]  ;;  %s486_s27 = sshll.u32 %s854_s5, 3 }
  0x3a   : > { %v278_v2 = vunpack.c.l.bf16 %v277_v0  ;;  %v275_v4 = vld [vmem:[%s229_s8] sm:$0xf]  ;;  %s267_s24 = scalar_lea.vmem [#allocation8], %s486_s27  ;;  %s492_s10 = sshll.u32 %s708_s18, 7 }
  0x3b   : > { %v276_v5 = vunpack.c.l.bf16 %v275_v4  ;;  %v490_v6 = vld [vmem:[%s923_s3] ss:$0 sm:$0xff]  ;;  %s372_s25 = sshll.u32 %s267_s24, 4  ;;  %s370_s7 = scalar_lea.hbm %s924_s4, %s492_s10  ;;  %s875_s25 = int_to_ptr.vmem [resolvable:$true] %s372_s25 }
  0x3c   : > { %v287_v3 = vmul.f32 %v487_v1, %v278_v2  ;;  %v310_v8 = vsub.f32 2.0, %v278_v2  ;;  %v312_v39 = vmul.f32 0.5, %v278_v2  ;;  %s359_s8 = scalar_lea.sflag [#allocation5], %s854_s5  ;;  %s632_s13 = scalar_lea.vmem %s875_s25, 128 }
  0x3d   : > { %v309_v7 = vadd.f32 %v490_v6, %v276_v5  ;;  %p633_p8 = scmp.ne.s32.totalorder %s875_s25, %s632_s13  ;;  %s720_s9 = smov [#allocation8]  }
  0x3e   : > { %288 = vadd.xlane.f32.xlu0 %v287_v3  ;;  %v313_v41 = vadd.f32 0.5, %v312_v39  ;;  %s636_s18 = sshll.u32 %s720_s9, 4  ;;  %s637_s18 = int_to_ptr.vmem [resolvable:$false] %s636_s18 }
  0x3f   : > { %v311_v9 = vmul.f32 %v310_v8, %v309_v7  ;;  %p634_p0 = pnand %p633_p8, %p797_p9  ;;  %s638_s26 = scalar_lea.vmem %s637_s18, 256 }
  0x40   : > { %p639_p13 = scmp.lt.s32.totalorder %s875_s25, %s637_s18  ;;  %p640_p5 = scmp.lt.s32.totalorder %s638_s26, %s632_s13 }
  0x41   : > { %v318_v10 = vand.u32 2147483647, %v311_v9  ;;  %v315_v21 = vmax.f32 %v311_v9, 0.0  ;;  %v316_v22 = vmul.f32 %v311_v9, %v278_v2  ;;  %p635_p3 = pneg %p634_p0 }
  0x42   : > { %p641_p12 = por %p640_p5, %p639_p13 }
  0x43   : > { %v319_v11 = vsub.f32 0.0, %v318_v10  ;;  %v317_v25 = vsub.f32 %v315_v21, %v316_v22 }
  0x44   : > { %p642_p6 = pnand %p641_p12, %p635_p3 }
  0x45   : > { %v320_v12 = vmul.f32 1.442695, %v319_v11 }
  0x47   : > { %564 = vpow2.f32 %v320_v12 }
  0x54   : > { %v565_v13 = vpop.eup %564 }
  0x55   : > { %v322_v14 = vadd.f32 1.0, %v565_v13  ;;  %v325_v17 = vmul.f32 -0.5, %v565_v13  ;;  %v328_v20 = vand.u32 2147483647, %v565_v13 }
  0x57   : > { %566 = vlog2.f32 %v322_v14  ;;  %v326_v18 = vadd.f32 1.0, %v325_v17  ;;  %vm329_vm0 = vcmp.lt.f32.partialorder %v328_v20, 0.0004427343 }
  0x59   : > { %v327_v24 = vmul.f32 %v565_v13, %v326_v18 }
  0x64   : > { %v567_v19 = vpop.eup %566 }
  0x65   : > { %v324_v23 = vmul.f32 0.6931472, %v567_v19 }
  0x67   : > { %v330_v27 = vsel %vm329_vm0, %v327_v24, %v324_v23 }
  0x68   : > { %v331_v30 = vadd.f32 %v330_v27, %v317_v25 }
  0x6a   : > { %v332_v33 = vsub.f32 0.0, %v331_v30 }
  0x6c   : > { %v333_v34 = vmul.f32 1.442695, %v332_v33 }
  0xc7   : > { %v289_v15 = vpop.xlane.xlu0 %288 }
  0xc8   : > { %v290_v16 = vmax.f32 %v289_v15, 1e-12 }
  0xca   : > { %568 = vrcp.f32 %v290_v16 }
  0xd7   : > { %v569_v26 = vpop.eup %568 }
  0xd8   : > { %v293_v28 = vmul.f32 %v569_v26, %v487_v1 }
  0xda   : > { %v488_v29 = vadd.f32 -0.2, %v293_v28 }
  0xdc   : > { %v489_v31 = vmul.f32 -10.0, %v488_v29 }
  0xde   : > { %v297_v32 = vmul.f32 1.442695, %v489_v31 }
  0xe0   : > { %570 = vpow2.f32 %v297_v32 }
  0xe1   : > { %572 = vpow2.f32 %v333_v34 }
  0xed   : > { %v571_v35 = vpop.eup %570 }
  0xee   : > { %v299_v36 = vadd.f32 1.0, %v571_v35  ;;  %v573_v37 = vpop.eup %572 }
  0xef   : > { %v335_v38 = vsub.f32 1.0, %v573_v37 }
  0xf0   : > { %574 = vrcp.f32 %v299_v36 }
  0xf1   : > { %v336_v40 = vmul.f32 2.0, %v335_v38 }
  0xf3   : > { %v337_v44 = vmul.f32 %v336_v40, %v335_v38 }
  0xfd   : > { %v575_v42 = vpop.eup %574 }
  0xfe   : > { %v302_v43 = vadd.f32 0.1, %v575_v42 }
 0x100   : > { %v314_v45 = vmul.f32 %v313_v41, %v302_v43 }
 0x102   : > { %v338_v46 = vmul.f32 %v337_v44, %v314_v45 }
 0x104   : > { %v339_v47 = vmul.f32 %v338_v46, %v331_v30 }
 0x106   : > { %347 = vadd.xlane.f32.xlu0 %v339_v47 }
 0x18f   : > { %v348_v48 = vpop.xlane.xlu0 %347 }
 0x190   : > { %v349_v49 = vrot.slane %v348_v48, 4 }
 0x192   : > { %v350_v50 = vadd.f32 %v349_v49, %v348_v48 }
 0x194   : > { %v351_v51 = vrot.slane %v350_v50, 2 }
 0x196   : > { %v352_v52 = vadd.f32 %v351_v51, %v350_v50 }
 0x198   : > { %v353_v53 = vrot.slane %v352_v52, 1 }
 0x19a   : > { %v354_v54 = vadd.f32 %v353_v53, %v352_v52 }
 0x19c   : > { %495 = vpush %v354_v54 }
 0x1cd   : > { %s496_s12 = spop %495 }
 0x1ce   : > { %v356_v55 = vstv %s496_s12 }
 0x1cf   : > { %357 = vst [vmem:[%s267_s24] sm:$0xff] %v356_v55 }
 0x1d0   : > { %645 = shalt.err (!%p642_p6)
}
 0x1d1   : > { %s646_s11 = scalar_lea.hbm %s370_s7, 128  ;;  %s650_s22 = scalar_lea.hbm %s924_s4, 256 }
 0x1d2   : > { %p647_p7 = scmp.ne.s32.totalorder %s370_s7, %s646_s11  ;;  %p651_p4 = scmp.lt.s32.totalorder %s370_s7, %s924_s4 }
 0x1d3   : > { %p652_p10 = scmp.lt.s32.totalorder %s650_s22, %s646_s11 }
 0x1d4   : > { %p648_p1 = pnand %p647_p7, %p797_p9 }
 0x1d5   : > { %p653_p8 = por %p652_p10, %p651_p4 }
 0x1d6   : > { %p649_p2 = pneg %p648_p1 }
 0x1d8   : > { %p654_p0 = pnand %p653_p8, %p649_p2 }
 0x1da   : > { %657 = shalt.err (!%p654_p0)
}
 0x1db   : > { %501 = dma.vmem_to_hbm [thread:$0]  (%p797_p9), %s875_s25, 128, %s370_s7, %s359_s8  }
 0x1dc PF: > { %s384_s10 = sand.u32 1, %s696_s15   ;;  %p931_p3 = scmp.ge.s32.totalorder %s716_s20, 2 }
 0x1dd   : > { %s385_s12 = scalar_lea.sflag [#allocation5], %s384_s10 }
 0x1de   : > { %p511_p13 = pnand %p931_p3, %p804_p11 }
 0x1e0   : > { %p512_p5 = pneg %p511_p13 }
 0x1e2   : > { %691 = dma.done.wait (%p512_p5), %s385_s12, 128  }
 0x1e3   : > { %693 = vsyncadd (%p512_p5), %s385_s12, 4294967168  ;;  %s23_s20 = sadd.s32 1, %s716_s20   ;;  %s932_s15 = smov %s700_s16 }
 0x1e4   : > { %p20_p12 = scmp.ge.s32.totalorder %s23_s20, 4   ;;  %s933_s16 = smov %s704_s17 }
 0x1e5   : > { %s934_s17 = smov %s802_s29  ;;  %s935_s18 = smov %s712_s19 }
 0x1e6   : > { %s936_s19 = smov %s938_s23  ;;  %22 = sbr.rel (!%p20_p12) target bundleno = 8 (0x8), region = 102 }
 0x1eb   :  { %390 = vsyncpa [#allocation4], 1 }
 0x1ec   :  { %392 = vsyncpa [#allocation4 + $0x1], 1 }
 0x1ed   :  { %393 = vsyncpa [#allocation7], 1 }
 0x1ee   :  { %395 = vsyncpa [#allocation7 + $0x1], 1 }
 0x1ef   :  { %396 = vsyncpa [#allocation5], 1 }
 0x1f0   :  { %398 = vsyncpa [#allocation5 + $0x1], 1 }

</bundles_post_ra>
